<compile_context>
chip_gen: v6e
topology: v6e:2x2x1
jax: 0.10.0
libtpu: 0.0.40
codegen_flags: <defaults>
</compile_context>

<pallas_src>
import jax
import jax.numpy as jnp
from jax import lax
from jax.experimental import pallas as pl
from jax.experimental.pallas import tpu as pltpu


def _round_up(x, m):
    return ((x + m - 1) // m) * m


def _conv_matmul_t_kernel(w_ref, p_ref, b_ref, o_ref):
    # One M-tile of:  out^T = W_eff^T @ patches^T + b_eff
    #   w_ref : (Cout_p, KKC)  ensemble-folded weights (compute dtype)
    #   p_ref : (KKC, TM)      transposed im2col patches (compute dtype)
    #   b_ref : (Cout_p, 1)    ensemble-folded bias (f32)
    #   o_ref : (Cout_p, TM)   f32 output tile (channel-major, lane-dense along M)
    acc = jnp.dot(w_ref[...], p_ref[...], preferred_element_type=jnp.float32)
    o_ref[...] = acc + b_ref[...]


def _im2col_t(x_nchw, k, dtype):
    """Transposed im2col: (B,C,H,W) -> (C*K*K, B*HO*WO); rows ordered (c, dy, dx)."""
    b, c, h, w = x_nchw.shape
    ho, wo = h - k + 1, w - k + 1
    x = x_nchw.astype(dtype)  # cast once, before any im2col materialization
    taps = jnp.stack(
        [x[:, :, dy:dy + ho, dx:dx + wo] for dy in range(k) for dx in range(k)],
        axis=2,
    )  # (B, C, K*K, HO, WO), tap order (dy, dx)
    pt = taps.transpose(1, 2, 0, 3, 4).reshape(c * k * k, b * ho * wo)
    return pt, ho, wo


def batch_ensemble_forward(x_nchw, weight_oihw, bias, pre, post, *, idx=None,
                           compute_dtype=jnp.bfloat16, tm_max=512):
    """BatchEnsemble forward (eval-mode ensemble average, or a single member if idx is given)."""
    n, c_in = pre.shape
    c_out = post.shape[1]
    k = weight_oihw.shape[-1]
    b = x_nchw.shape[0]
    kkc = c_in * k * k

    # weight (Cout, Cin, KH, KW) -> (Cout, Cin*KH*KW); columns ordered (c, dy, dx), matching patches
    w_t = weight_oihw.reshape(c_out, kkc).astype(jnp.float32)
    pre_tiled = jnp.repeat(pre, k * k, axis=1)  # (n, Cin*KH*KW)

    # ---- fold pre/post (and the ensemble mean at eval time) into effective weights (f32) ----
    if idx is not None:
        w_eff = post[idx][:, None] * w_t * pre_tiled[idx][None, :]
        b_eff = bias * post[idx]
    else:
        w_eff = jnp.mean(post[:, :, None] * w_t[None, :, :] * pre_tiled[:, None, :], axis=0)
        b_eff = bias * jnp.mean(post, axis=0)

    # pad Cout only to an f32 sublane group (multiple of 8) — NOT to 128
    c_out_p = max(8, _round_up(c_out, 8))
    w_eff = jnp.pad(w_eff, ((0, c_out_p - c_out), (0, 0))).astype(compute_dtype)
    b_eff = jnp.pad(b_eff, (0, c_out_p - c_out)).reshape(c_out_p, 1).astype(jnp.float32)

    # ---- transposed im2col patches, already in compute dtype; no extra pad/cast passes ----
    patches_t, ho, wo = _im2col_t(x_nchw, k, compute_dtype)  # (kkc, M)
    m = patches_t.shape[1]

    # Lane (M) tile: big tiles (low per-step overhead on v5e/v6e) but >=2 tiles when possible
    # so "parallel" can shard across v7x's 2 TensorCores and the pipeline has >1 step.
    tm = min(tm_max, max(128, _round_up(pl.cdiv(m, 2), 128)))
    grid = (pl.cdiv(m, tm),)  # last block may be partial; over-read cols are never written back

    out_t = pl.pallas_call(
        _conv_matmul_t_kernel,
        out_shape=jax.ShapeDtypeStruct((c_out_p, m), jnp.float32),
        grid_spec=pltpu.PrefetchScalarGridSpec(
            num_scalar_prefetch=0,
            grid=grid,
            in_specs=[
                pl.BlockSpec((c_out_p, kkc), lambda i: (0, 0)),  # W_eff^T (shared across tiles)
                pl.BlockSpec((kkc, tm), lambda i: (0, i)),       # patches^T tile (lane-dense M)
                pl.BlockSpec((c_out_p, 1), lambda i: (0, 0)),    # b_eff (shared)
            ],
            out_specs=pl.BlockSpec((c_out_p, tm), lambda i: (0, i)),
        ),
        compiler_params=pltpu.CompilerParams(
            dimension_semantics=("parallel",),      # independent M tiles -> megacore on v7x
            vmem_limit_bytes=32 * 1024 * 1024,      # tiles are tiny; safe on v5e/v6e/v7x
        ),
    )(w_eff, patches_t, b_eff)

    # channel-major output -> NCHW (cheap leading-axes permute); adn_fn = Identity -> no-op
    out = out_t[:c_out, :].reshape(c_out, b, ho, wo).transpose(1, 0, 2, 3)
    return out


def _reference(x_nchw, weight_oihw, bias, pre, post, *, idx=None):
    def one(i):
        xs = x_nchw * pre[i][None, :, None, None]
        y = lax.conv_general_dilated(
            xs, weight_oihw, window_strides=(1, 1), padding="VALID",
            dimension_numbers=("NCHW", "OIHW", "NCHW"),
        ) + bias[None, :, None, None]
        return y * post[i][None, :, None, None]

    if idx is not None:
        return one(idx)
    return jnp.mean(jnp.stack([one(i) for i in range(pre.shape[0])]), axis=0)


if __name__ == "__main__":
    # Module config: spatial_dim=2, n=4, in_channels=4, out_channels=8, kernel_size=3 (default)
    n, c_in, c_out, k = 4, 4, 8, 3
    B, H, W = 2, 16, 16

    key = jax.random.PRNGKey(0)
    kx, kw, kb, kpre, kpost = jax.random.split(key, 5)

    x = jax.random.normal(kx, (B, c_in, H, W), dtype=jnp.float32)
    # Conv2d parameters (deterministic synthetic init; Conv2d weight shape = (Cout, Cin, KH, KW))
    weight = jax.random.normal(kw, (c_out, c_in, k, k), dtype=jnp.float32) * 0.1
    bias = jax.random.normal(kb, (c_out,), dtype=jnp.float32) * 0.1
    # all_weights['pre'] ~ N(1, 0.1) of [n, in_channels]; 'post' ~ N(1, 0.1) of [n, out_channels]
    pre = 1.0 + 0.1 * jax.random.normal(kpre, (n, c_in), dtype=jnp.float32)
    post = 1.0 + 0.1 * jax.random.normal(kpost, (n, c_out), dtype=jnp.float32)

    ref = _reference(x, weight, bias, pre, post)
    ref_idx = _reference(x, weight, bias, pre, post, idx=1)

    # --- f32 compute path: tight check of kernel + ensemble-fold correctness ---
    out_f32 = jax.block_until_ready(
        batch_ensemble_forward(x, weight, bias, pre, post, compute_dtype=jnp.float32))
    assert out_f32.shape == (B, c_out, H - k + 1, W - k + 1)
    assert jnp.allclose(out_f32, ref, atol=1e-4, rtol=1e-4), float(jnp.max(jnp.abs(out_f32 - ref)))

    out_idx_f32 = jax.block_until_ready(
        batch_ensemble_forward(x, weight, bias, pre, post, idx=1, compute_dtype=jnp.float32))
    assert jnp.allclose(out_idx_f32, ref_idx, atol=1e-4, rtol=1e-4)

    # --- bf16 MXU path (performance default): looser tolerance for bf16 input rounding ---
    out_bf16 = jax.block_until_ready(batch_ensemble_forward(x, weight, bias, pre, post))
    assert jnp.allclose(out_bf16, ref, atol=5e-2, rtol=5e-2), float(jnp.max(jnp.abs(out_bf16 - ref)))

    out_idx_bf16 = jax.block_until_ready(batch_ensemble_forward(x, weight, bias, pre, post, idx=1))
    assert jnp.allclose(out_idx_bf16, ref_idx, atol=5e-2, rtol=5e-2)

    print("KERNEL_OK")
</pallas_src>

<mosaic_0001>
module attributes {stable_mosaic.version = 11 : i64} {
  func.func @_conv_matmul_t_kernel(%arg0: i32, %arg1: memref<8x36xf32, #tpu.memory_space<vmem>>, %arg2: memref<36x256xf32, #tpu.memory_space<vmem>>, %arg3: memref<8x1xf32, #tpu.memory_space<vmem>>, %arg4: memref<8x256xf32, #tpu.memory_space<vmem>>) attributes {dimension_semantics = [#tpu.dimension_semantics<parallel>], iteration_bounds = array<i64: 2>, scalar_prefetch = 0 : i64, scratch_operands = 0 : i64, tpu.core_type = #tpu.core_type<tc>, window_params = [{pipeline_mode = #tpu.pipeline_mode<synchronous>, transform_indices = @transform_0, window_bounds = array<i64: 8, 36>}, {transform_indices = @transform_1, window_bounds = array<i64: 36, 256>}, {pipeline_mode = #tpu.pipeline_mode<synchronous>, transform_indices = @transform_2, window_bounds = array<i64: 8, 1>}, {transform_indices = @transform_3, window_bounds = array<i64: 8, 256>}]} {
    %c0 = arith.constant 0 : index
    %c0_0 = arith.constant 0 : index
    %0 = vector.load %arg1[%c0, %c0_0] : memref<8x36xf32, #tpu.memory_space<vmem>>, vector<8x36xf32>
    %c0_1 = arith.constant 0 : index
    %c0_2 = arith.constant 0 : index
    %1 = vector.load %arg2[%c0_1, %c0_2] : memref<36x256xf32, #tpu.memory_space<vmem>>, vector<36x256xf32>
    %cst = arith.constant dense<0.000000e+00> : vector<8x256xf32>
    %2 = tpu.matmul %0, %1, %cst {dimension_numbers = #tpu.dot_dimension_numbers<[1], [0], [0], [1], [0, 0, 1, 1], [], []>} : vector<8x36xf32>, vector<36x256xf32>, vector<8x256xf32> -> vector<8x256xf32>
    %c0_3 = arith.constant 0 : index
    %c0_4 = arith.constant 0 : index
    %3 = vector.load %arg3[%c0_3, %c0_4] : memref<8x1xf32, #tpu.memory_space<vmem>>, vector<8x1xf32>
    %4 = vector.broadcast %3 : vector<8x1xf32> to vector<8x256xf32>
    %5 = arith.addf %2, %4 : vector<8x256xf32>
    %c0_5 = arith.constant 0 : index
    %c0_6 = arith.constant 0 : index
    %6 = vector.load %arg4[%c0_5, %c0_6] : memref<8x256xf32, #tpu.memory_space<vmem>>, vector<8x256xf32>
    tpu.vector_store %arg4[%c0_5, %c0_6], %5 {strides = array<i32>} : memref<8x256xf32, #tpu.memory_space<vmem>>, vector<8x256xf32>,
    return
  }
  func.func @transform_0(%arg0: i32) -> (i32, i32) {
    %c0_i32 = arith.constant 0 : i32
    %c0_i32_0 = arith.constant 0 : i32
    %c0_i32_1 = arith.constant 0 : i32
    return %c0_i32, %c0_i32_0 : i32, i32
  }
  func.func @transform_1(%arg0: i32) -> (i32, i32) {
    %c0_i32 = arith.constant 0 : i32
    %c0_i32_0 = arith.constant 0 : i32
    return %c0_i32, %arg0 : i32, i32
  }
  func.func @transform_2(%arg0: i32) -> (i32, i32) {
    %c0_i32 = arith.constant 0 : i32
    %c0_i32_0 = arith.constant 0 : i32
    %c0_i32_1 = arith.constant 0 : i32
    return %c0_i32, %c0_i32_0 : i32, i32
  }
  func.func @transform_3(%arg0: i32) -> (i32, i32) {
    %c0_i32 = arith.constant 0 : i32
    %c0_i32_0 = arith.constant 0 : i32
    return %c0_i32, %arg0 : i32, i32
  }
}

</mosaic_0001>

<bundles_post_ra>
// kernel: tpu_custom_call.1
= control target key start
LH: loop header
LB: loop body
LE: loop exit
PB: predicated region body
PF: predicated region fallthrough
CT: control target
= control target key end

     0   :  { %8 = vsyncpa [#allocation3], 0  ;;  %s712_s0 = inlined_call_operand.vmem [shape: f32[8,36], index: 0, kind: input, shape index: {}]   ;;  %s713_s1 = inlined_call_operand.hbm [shape: f32[36,392], index: 1, kind: input, shape index: {}]   ;;  %s714_s2 = inlined_call_operand.vmem [shape: f32[8,1], index: 2, kind: input, shape index: {}]   ;;  %s715_s3 = inlined_call_operand.hbm [shape: f32[8,392], index: 3, kind: output, shape index: {}]  }
   0x1   :  { %10 = vsyncpa [#allocation3 + $0x1], 0 }
   0x2   :  { %11 = vsyncpa [#allocation4], 0 }
   0x3   :  { %13 = vsyncpa [#allocation4 + $0x1], 0  ;;  %s569_s12 = smov 0   ;;  %s571_s13 = smov 0  }
   0x4   :  { %s573_s14 = smov 0   ;;  %s575_s15 = smov 0  }
   0x5 LB: > { %s590_s16 = sadd.s32 4294967295, %s540_s15   ;;  %s377_s17 = sadd.s32 4294967294, %s540_s15   ;;  %s540_s15 = sphi %s575_s15, %s730_s15   ;;  %s536_s14 = sphi %s573_s14, %s729_s14   ;;  %s532_s13 = sphi %s571_s13, %s728_s13   ;;  %s528_s12 = sphi %s569_s12, %s727_s12  }
   0x6   : > { %s594_s18 = sadd.s32 1, %s540_s15   ;;  %s47_s19 = sadd.s32 1, %s536_s14 }
   0x7   : > { %s44_s20 = ssub.s32 %s540_s15, %s594_s18  ;;  %p54_p0 = scmp.ne.s32.totalorder %s536_s14, %s532_s13 }
   0x8   : > { %p45_p1 = scmp.eq.s32.totalorder %s44_s20, 0  ;;  %p55_p2 = scmp.eq.s32.totalorder %s540_s15, 0 }
   0x9   : > { %p60_p3 = scmp.ne.s32.totalorder %s532_s13, %s528_s12  ;;  %p61_p4 = scmp.eq.s32.totalorder %s590_s16, 0 }
   0xa   : > { %s606_s21 = scalar_select %p45_p1, %s536_s14, %s47_s19  }
   0xb   : > { %p56_p5 = por %p55_p2, %p54_p0  ;;  %p608_p6 = por %p61_p4, %p60_p3 }
   0xc   : > { %p105_p7 = scmp.eq.s32.totalorder %s590_s16, 1  ;;  %p111_p8 = scmp.eq.s32.totalorder %s377_s17, 1 }
   0xd   : > { %s718_s22 = scalar_select %p608_p6, 1, 0 }
   0xe   : > { %p408_p10 = scmp.lt.s32.totalorder %s540_s15, 2  ;;  %p615_p11 = por %p105_p7, %p54_p0 }
   0xf   : > { %p619_p12 = por %p111_p8, %p60_p3  ;;  %s137_s25 = sand.u32 1, %s536_s14  }
  0x10   : > { %s719_s23 = scalar_select %p615_p11, 1, 0 }
  0x11   : > { %s720_s24 = scalar_select %p619_p12, 1, 0 }
  0x12   : > { %s392_s26 = sshll.u32 %s540_s15, 8  ;;  %s394_s27 = smul.u32 80, %s137_s25 }
  0x13   : > { %s628_s30 = scalar_lea.hbm %s713_s1, %s392_s26  ;;  %p630_p13 = pnand %p408_p10, %p56_p5 }
  0x14   : > { %s141_s5 = scalar_lea.vmem [#allocation2], %s394_s27  ;;  %s637_s7 = scalar_lea.sflag [#allocation3], %s137_s25 }
  0x15   : > { %s148_s6 = sshll.u32 %s141_s5, 4  ;;  %s448_s8 = scalar_lea.hbm %s628_s30, 1280  ;;  %s634_s6 = int_to_ptr.vmem [resolvable:$true] %s148_s6 }
  0x16   : > { %p449_p1 = scmp.ne.s32.totalorder %s628_s30, %s448_s8  ;;  %p450_p2 = pneg %p630_p13 }
  0x17   : > { %s453_s11 = scalar_lea.hbm %s713_s1, 2560  ;;  %p454_p5 = scmp.lt.s32.totalorder %s628_s30, %s713_s1 }
  0x18   : > { %p451_p3 = pnand %p450_p2, %p449_p1  ;;  %p455_p7 = scmp.lt.s32.totalorder %s453_s11, %s448_s8 }
  0x1a   : > { %p452_p4 = pneg %p451_p3  ;;  %p456_p8 = por %p455_p7, %p454_p5 }
  0x1c   : > { %p457_p10 = pnand %p456_p8, %p452_p4 }
  0x1e   : > { %460 = shalt.err (!%p457_p10)
}
  0x1f   : > { %s461_s20 = scalar_lea.vmem %s634_s6, 1280  ;;  %s542_s25 = smov [#allocation2]  }
  0x20   : > { %p462_p9 = scmp.ne.s32.totalorder %s634_s6, %s461_s20  ;;  %s466_s26 = sshll.u32 %s542_s25, 4  ;;  %s467_s26 = int_to_ptr.vmem [resolvable:$false] %s466_s26 }
  0x21   : > { %s468_s27 = scalar_lea.vmem %s467_s26, 2560  ;;  %p469_p3 = scmp.lt.s32.totalorder %s634_s6, %s467_s26 }
  0x22   : > { %p464_p0 = pnand %p462_p9, %p450_p2  ;;  %p470_p12 = scmp.lt.s32.totalorder %s468_s27, %s461_s20 }
  0x24   : > { %p465_p1 = pneg %p464_p0  ;;  %p471_p11 = por %p470_p12, %p469_p3 }
  0x26   : > { %p472_p6 = pnand %p471_p11, %p465_p1 }
  0x28   : > { %475 = shalt.err (!%p472_p6)
}
  0x29   : > { %s543_s28 = smov 512   ;;  %s544_s29 = smov 256  }
  0x2a   : > { %s545_s5 = smov 16   ;;  %p156_p9 = scmp.lt.s32.totalorder %s540_s15, 3 }
  0x2b   : > { %403 = dma.hbm_to_vmem [thread:$0]  (!%p630_p13), %s628_s30, 1280, %s634_s6, %s637_s7, %s543_s28, %s544_s29, %s545_s5  }
  0x2c   : > { %p722_p0 = scmp.ge.s32.totalorder %s540_s15, 1 }
  0x2e   : > { %p157_p2 = pnand %p722_p0, %p156_p9 }
  0x2f   : > { %s662_s8 = sand.u32 (!%p157_p2), 1, %s532_s13   ;;  %p723_p6 = scmp.ne.s32.totalorder (!%p157_p2), %s718_s22, 0 }
  0x30   : > { %160 = sbr.rel (%p157_p2) target bundleno = 276 (0x114), region = 32  ;;  %s163_s10 = scalar_lea.sflag (!%p157_p2), [#allocation3], %s662_s8 }
  0x31   : > { %s395_s9 = smul.u32 (!%p157_p2), 80, %s662_s8 }
  0x33   : > { %s166_s11 = scalar_lea.vmem (!%p157_p2), [#allocation2], %s395_s9 }
  0x35   : > { %519 = dma.done.wait (%p723_p6), %s163_s10, 1280  }
  0x36   : > { %521 = vsyncadd (%p723_p6), %s163_s10, 4294966016  ;;  %v546_v0 = vmov 0.0   ;;  %v547_v1 = vmov 0   ;;  %vm212_vm0 = vcmask 1043456   ;;  %v201_v2 = vld [vmem:[%s166_s11 + $0x48] sm:$0xf] }
  0x37   : > { %283 = vmatprep.mubr.f32.mxu0 %v546_v0  ;;  %447 = vset.pattern.permute.xlu0 %v547_v1  ;;  %v200_v3 = vld [vmem:[%s166_s11 + $0x40] sm:$0xf]  ;;  %v199_v4 = vld [vmem:[%s166_s11 + $0x38] sm:$0xff]  ;;  %v198_v5 = vld [vmem:[%s166_s11 + $0x30] sm:$0xff]  ;;  %vm208_vm1 = vcmask 293888   ;;  %s383_s7 = sshll.u32 %s662_s8, 4 }
  0x38   : > { %384 = vmatprep.subr.msk.mxu0 %vm212_vm0, %v201_v2  ;;  %v197_v6 = vld [vmem:[%s166_s11 + $0x28] sm:$0xff]  ;;  %v196_v7 = vld [vmem:[%s166_s11 + $0x20] sm:$0xff]  ;;  %v195_v9 = vld [vmem:[%s166_s11 + $0x18] sm:$0xff]  ;;  %s393_s17 = sshll.u32 %s590_s16, 8  ;;  %s188_s19 = scalar_lea.vmem [#allocation5], %s383_s7 }
  0x39   : > { %385 = vmatpush1.msk.msra.mxu0 %vm212_vm0, %v200_v3  ;;  %v202_v8 = vld [vmem:[%s714_s2] sm:$0xff]  ;;  %v193_v11 = vld [vmem:[%s166_s11 + $0x8] sm:$0xff]  ;;  %s307_s20 = sshll.u32 %s188_s19, 4  ;;  %s305_s27 = scalar_lea.hbm %s715_s3, %s393_s17  ;;  %s308_s20 = int_to_ptr.vmem [resolvable:$true] %s307_s20 }
  0x3a   : > { %243 = vmatprep.subr.mxu0 %v199_v4  ;;  %205 = vperm.xlu0 %447, %v202_v8   ;;  %v194_v10 = vld [vmem:[%s166_s11 + $0x10] sm:$0xff]  ;;  %v192_v12 = vld [vmem:[%s166_s11] sm:$0xff]  ;;  %s293_s28 = scalar_lea.sflag [#allocation4], %s662_s8  ;;  %s476_s29 = scalar_lea.vmem %s308_s20, 256 }
  0x3b   : > { %244 = vmatpush1.msra.mxu0 %v198_v5  ;;  %v191_v13 = vld [vmem:[%s712_s0] sm:$0xff]  ;;  %p477_p11 = scmp.ne.s32.totalorder %s308_s20, %s476_s29  ;;  %p724_p12 = scmp.ne.s32.totalorder %s719_s23, 0 }
  0x3c   : > { %245 = vmatprep.subr.mxu0 %v197_v6  ;;  %s548_s5 = smov [#allocation5]  }
  0x3d   : > { %246 = vmatpush1.msra.mxu0 %v196_v7  ;;  %p478_p13 = pnand %p477_p11, %p724_p12  ;;  %s480_s16 = sshll.u32 %s548_s5, 4  ;;  %s481_s16 = int_to_ptr.vmem [resolvable:$false] %s480_s16 }
  0x3e   : > { %247 = vmatprep.subr.mxu0 %v195_v9  ;;  %s482_s9 = scalar_lea.vmem %s481_s16, 512  ;;  %p483_p5 = scmp.lt.s32.totalorder %s308_s20, %s481_s16 }
  0x3f   : > { %248 = vmatpush1.msra.mxu0 %v194_v10  ;;  %p479_p4 = pneg %p478_p13  ;;  %p484_p7 = scmp.lt.s32.totalorder %s482_s9, %s476_s29 }
  0x40   : > { %249 = vmatprep.subr.mxu0 %v193_v11 }
  0x41   : > { %250 = vmatpush1.msra.mxu0 %v192_v12  ;;  %p485_p8 = por %p484_p7, %p483_p5 }
  0x42   : > { %386 = vmatmul.mubr.msk.f32.vlgmr.msra.gmra.mxu0 %vm208_vm1, %v191_v13 }
  0x43   : > { %p486_p10 = pnand %p485_p8, %p479_p4 }
  0xb5   : > { %v206_v14 = vpop.permute.xlu0 %205 }
 0x102   : > { %v285_v15 = vpop.f32.mrf.mxu0 }
 0x103   : > { %v286_v16 = vadd.f32 %v285_v15, %v206_v14 }
 0x104   : > { %v287_v17 = vpop.f32.mrf.mxu0 }
 0x105   : > { %290 = vst [vmem:[%s188_s19] sm:$0xff] %v286_v16  ;;  %v288_v18 = vadd.f32 %v287_v17, %v206_v14 }
 0x107   : > { %291 = vst [vmem:[%s188_s19 + $0x8] sm:$0xff] %v288_v18 }
 0x108   : > { %489 = shalt.err (!%p486_p10)
}
 0x109   : > { %s490_s10 = scalar_lea.hbm %s305_s27, 256  ;;  %s494_s30 = scalar_lea.hbm %s715_s3, 512 }
 0x10a   : > { %p491_p1 = scmp.ne.s32.totalorder %s305_s27, %s490_s10  ;;  %p495_p0 = scmp.lt.s32.totalorder %s305_s27, %s715_s3 }
 0x10b   : > { %p496_p2 = scmp.lt.s32.totalorder %s494_s30, %s490_s10 }
 0x10c   : > { %p492_p3 = pnand %p491_p1, %p724_p12 }
 0x10d   : > { %p497_p6 = por %p496_p2, %p495_p0 }
 0x10e   : > { %p493_p9 = pneg %p492_p3 }
 0x110   : > { %p498_p11 = pnand %p497_p6, %p493_p9 }
 0x112   : > { %501 = shalt.err (!%p498_p11)
}
 0x113   : > { %398 = dma.vmem_to_hbm [thread:$0]  (%p724_p12), %s308_s20, 256, %s305_s27, %s293_s28  }
 0x114 PF: > { %s319_s6 = sand.u32 1, %s528_s12   ;;  %p725_p13 = scmp.ne.s32.totalorder %s720_s24, 0 }
 0x115   : > { %p726_p4 = scmp.ge.s32.totalorder %s540_s15, 2  ;;  %s320_s7 = scalar_lea.sflag [#allocation4], %s319_s6 }
 0x117   : > { %p405_p5 = pnand %p726_p4, %p725_p13 }
 0x119   : > { %p406_p7 = pneg %p405_p5 }
 0x11b   : > { %523 = dma.done.wait (%p406_p7), %s320_s7, 256  }
 0x11c   : > { %525 = vsyncadd (%p406_p7), %s320_s7, 4294967040  ;;  %p16_p8 = scmp.ge.s32.totalorder %s594_s18, 4   ;;  %s727_s12 = smov %s532_s13 }
 0x11d   : > { %s728_s13 = smov %s536_s14  ;;  %s729_s14 = smov %s606_s21 }
 0x11e   : > { %s730_s15 = smov %s594_s18  ;;  %18 = sbr.rel (!%p16_p8) target bundleno = 5 (0x5), region = 77 }
 0x123   :  { %325 = vsyncpa [#allocation3], 1 }
 0x124   :  { %327 = vsyncpa [#allocation3 + $0x1], 1 }
 0x125   :  { %328 = vsyncpa [#allocation4], 1 }
 0x126   :  { %330 = vsyncpa [#allocation4 + $0x1], 1 }

</bundles_post_ra>
